<compile_context>
chip_gen: v5e
topology: v5e:2x2
jax: 0.10.0
libtpu: 0.0.40
codegen_flags: <defaults>
</compile_context>

<pallas_src>
import jax
import jax.numpy as jnp
from jax.experimental import pallas as pl
from jax.experimental.pallas import tpu as pltpu


def _normalize_kernel(sb_ref, x_ref, o_ref):
    # sb_ref : (TR, 2) float32; column 0 = scale (1/std), column 1 = bias (-mean/std)
    # x_ref / o_ref : (TR, TL) tile of the flattened (N*C, H*W) view
    sb = sb_ref[...]
    scale = sb[:, 0:1]          # (TR, 1) -> broadcast across lanes
    bias = sb[:, 1:2]
    x = x_ref[...].astype(jnp.float32)
    o_ref[...] = (x * scale + bias).astype(o_ref.dtype)


def _cdiv(a, b):
    return -(-a // b)


# The (TR, 2) f32 scale/bias block pads its last dim to 128 lanes in VMEM.
_SB_ROW_PAD_BYTES = 128 * 4


def _tpu_tuning():
    """Generation-aware block target / scoped-VMEM limit / minimum grid steps."""
    try:
        kind = jax.devices()[0].device_kind.lower()
    except Exception:
        kind = ""
    if "v7" in kind:
        # 2 TCs/chip, 64 MiB physical VMEM, 3.2 TB/s HBM: bigger blocks to
        # amortize the ~0.35 us step overhead, explicit scoped-VMEM headroom,
        # and enough grid steps to feed both cores.
        return {"target_bytes": 6 << 20, "vmem_limit_bytes": 48 << 20, "min_blocks": 4}
    if "v6" in kind:
        # 32 MiB default scoped VMEM: 4 MiB blocks (double-buffered in+out
        # ~16 MiB) fit without raising the limit.
        return {"target_bytes": 4 << 20, "vmem_limit_bytes": None, "min_blocks": 1}
    if "v5" in kind:
        # 16 MiB default scoped VMEM: keep ~2 MiB blocks (~8 MiB footprint).
        return {"target_bytes": 2 << 20, "vmem_limit_bytes": None, "min_blocks": 1}
    # Unknown backend: conservative.
    return {"target_bytes": 2 << 20, "vmem_limit_bytes": None, "min_blocks": 2}


def _pick_tiles(rows, lanes, elem_bytes, target_bytes):
    """Choose (TR, TL) with TR*TL*elem_bytes (+ scale/bias padding) ~= target_bytes,
    respecting the dtype's (sublane, 128) tiling constraint."""
    sublane = max(8, 32 // elem_bytes)   # 8 (f32), 16 (bf16/f16), 32 (int8/fp8)

    # Lane (last) dim: reserve at least one sublane tile's worth of rows BEFORE
    # sizing lanes, so TL cannot consume the whole target and force an
    # 8x/16x-oversized block when H*W is large.
    min_rows = min(rows, sublane)
    lane_budget = max(128, target_bytes // max(min_rows * elem_bytes, 1))
    if lanes <= lane_budget:
        tl = lanes                                   # full extent (always legal)
    else:
        tl = max(128, (lane_budget // 128) * 128)    # multiple of 128

    # Row (second-to-last) dim: fill the remaining budget, accounting for the
    # lane-padded scale/bias block that accompanies each tile.
    row_bytes = tl * elem_bytes + _SB_ROW_PAD_BYTES
    row_budget = max(1, target_bytes // row_bytes)
    if rows <= row_budget:
        tr = rows                                    # full extent (always legal)
    else:
        tr = max(sublane, (row_budget // sublane) * sublane)
    return tr, tl, sublane


def _ensure_min_blocks(rows, lanes, tr, tl, sublane, min_blocks):
    """Shrink tiles until the grid has >= min_blocks steps (keeps every
    TensorCore busy on multi-core chips such as v7x)."""
    while _cdiv(rows, tr) * _cdiv(lanes, tl) < min_blocks:
        if tr > sublane:
            tr = max(sublane, ((tr // 2) // sublane) * sublane)
        elif tl > 128:
            tl = max(128, ((tl // 2) // 128) * 128)
        else:
            break
    return tr, tl


@jax.jit
def normalize_by_channel_mean_std(x, mean, std):
    """x: (N, C, H, W); mean, std: (C,). Returns (x - mean[None,:,None,None]) / std[...]."""
    N, C, H, W = x.shape
    R = N * C
    L = H * W

    mean = mean.astype(jnp.float32)
    std = std.astype(jnp.float32)

    # Per-row affine params packed as one (R, 2) array: out = x * scale + bias.
    inv_std = 1.0 / std                              # (C,)
    scale_row = jnp.tile(inv_std, N)                 # (R,)
    bias_row = jnp.tile(-mean * inv_std, N)          # (R,)
    sb = jnp.stack([scale_row, bias_row], axis=-1)   # (R, 2) float32

    # Lane-dense flattened view (contiguous reshape, no data movement).
    x2 = x.reshape(R, L)

    elem_bytes = jnp.dtype(x.dtype).itemsize
    tuning = _tpu_tuning()
    tr, tl, sublane = _pick_tiles(R, L, elem_bytes, tuning["target_bytes"])
    tr, tl = _ensure_min_blocks(R, L, tr, tl, sublane, tuning["min_blocks"])

    grid = (_cdiv(R, tr), _cdiv(L, tl))

    cp_kwargs = {"dimension_semantics": ("parallel", "parallel")}
    if tuning["vmem_limit_bytes"] is not None:
        cp_kwargs["vmem_limit_bytes"] = tuning["vmem_limit_bytes"]

    out2 = pl.pallas_call(
        _normalize_kernel,
        out_shape=jax.ShapeDtypeStruct((R, L), x.dtype),
        grid=grid,
        in_specs=[
            pl.BlockSpec((tr, 2), lambda r, l: (r, 0)),    # packed scale/bias column
            pl.BlockSpec((tr, tl), lambda r, l: (r, l)),   # x tile
        ],
        out_specs=pl.BlockSpec((tr, tl), lambda r, l: (r, l)),
        compiler_params=pltpu.CompilerParams(**cp_kwargs),
        cost_estimate=pl.CostEstimate(
            flops=2 * R * L,
            transcendentals=0,
            bytes_accessed=2 * R * L * elem_bytes + R * 2 * 4,
        ),
    )(sb, x2)

    return out2.reshape(N, C, H, W)


if __name__ == "__main__":
    # Deterministic "buffers" (the module's __init__: per-channel mean/std).
    C = 4
    mean = jnp.array([0.485, 0.456, 0.406, 0.5], dtype=jnp.float32)
    std = jnp.array([0.229, 0.224, 0.225, 0.25], dtype=jnp.float32)

    key = jax.random.PRNGKey(0)
    x = jax.random.normal(key, (2, C, 16, 16), dtype=jnp.float32)

    out = jax.block_until_ready(normalize_by_channel_mean_std(x, mean, std))

    # Reference check in plain JAX (same broadcasting as the PyTorch module).
    ref = (x - mean[None, :, None, None]) / std[None, :, None, None]
    assert out.shape == x.shape and out.dtype == x.dtype
    # multiply-by-reciprocal vs divide differs by ~1 ulp; slightly looser tol.
    assert jnp.allclose(out, ref, atol=1e-5, rtol=1e-5)

    # Second shape: R not a multiple of 8 (full-extent row block path).
    mean3 = jnp.array([0.485, 0.456, 0.406], dtype=jnp.float32)
    std3 = jnp.array([0.229, 0.224, 0.225], dtype=jnp.float32)
    x2 = jax.random.normal(jax.random.PRNGKey(0), (2, 3, 48, 64), dtype=jnp.float32)
    out2 = jax.block_until_ready(normalize_by_channel_mean_std(x2, mean3, std3))
    ref2 = (x2 - mean3[None, :, None, None]) / std3[None, :, None, None]
    assert jnp.allclose(out2, ref2, atol=1e-5, rtol=1e-5)

    print("KERNEL_OK")
</pallas_src>

<mosaic_0001>
module attributes {stable_mosaic.version = 11 : i64} {
  func.func @_normalize_kernel(%arg0: i32, %arg1: i32, %arg2: memref<8x2xf32, #tpu.memory_space<vmem>>, %arg3: memref<8x128xf32, #tpu.memory_space<vmem>>, %arg4: memref<8x128xf32, #tpu.memory_space<vmem>>) attributes {dimension_semantics = [#tpu.dimension_semantics<parallel>, #tpu.dimension_semantics<parallel>], iteration_bounds = array<i64: 1, 2>, scalar_prefetch = 0 : i64, scratch_operands = 0 : i64, tpu.core_type = #tpu.core_type<tc>, window_params = [{transform_indices = @transform_0, window_bounds = array<i64: 8, 2>}, {transform_indices = @transform_1, window_bounds = array<i64: 8, 128>}, {transform_indices = @transform_2, window_bounds = array<i64: 8, 128>}]} {
    %c0 = arith.constant 0 : index
    %c0_0 = arith.constant 0 : index
    %0 = vector.load %arg2[%c0, %c0_0] : memref<8x2xf32, #tpu.memory_space<vmem>>, vector<8x2xf32>
    %1 = vector.extract_strided_slice %0 {offsets = [0, 0], sizes = [8, 1], strides = [1, 1]} : vector<8x2xf32> to vector<8x1xf32>
    %2 = vector.extract_strided_slice %0 {offsets = [0, 1], sizes = [8, 1], strides = [1, 1]} : vector<8x2xf32> to vector<8x1xf32>
    %c0_1 = arith.constant 0 : index
    %c0_2 = arith.constant 0 : index
    %3 = vector.load %arg3[%c0_1, %c0_2] : memref<8x128xf32, #tpu.memory_space<vmem>>, vector<8x128xf32>
    %4 = vector.broadcast %1 : vector<8x1xf32> to vector<8x128xf32>
    %5 = arith.mulf %3, %4 : vector<8x128xf32>
    %6 = vector.broadcast %2 : vector<8x1xf32> to vector<8x128xf32>
    %7 = arith.addf %5, %6 : vector<8x128xf32>
    %c0_3 = arith.constant 0 : index
    %c0_4 = arith.constant 0 : index
    %8 = vector.load %arg4[%c0_3, %c0_4] : memref<8x128xf32, #tpu.memory_space<vmem>>, vector<8x128xf32>
    tpu.vector_store %arg4[%c0_3, %c0_4], %7 {strides = array<i32>} : memref<8x128xf32, #tpu.memory_space<vmem>>, vector<8x128xf32>,
    return
  }
  func.func @transform_0(%arg0: i32, %arg1: i32) -> (i32, i32) {
    %c0_i32 = arith.constant 0 : i32
    %c0_i32_0 = arith.constant 0 : i32
    return %arg0, %c0_i32 : i32, i32
  }
  func.func @transform_1(%arg0: i32, %arg1: i32) -> (i32, i32) {
    %c0_i32 = arith.constant 0 : i32
    return %arg0, %arg1 : i32, i32
  }
  func.func @transform_2(%arg0: i32, %arg1: i32) -> (i32, i32) {
    %c0_i32 = arith.constant 0 : i32
    return %arg0, %arg1 : i32, i32
  }
}

</mosaic_0001>

<bundles_post_ra>
// kernel: tile.13
= control target key start
LH: loop header
LB: loop body
LE: loop exit
PB: predicated region body
PF: predicated region fallthrough
CT: control target
= control target key end

     0   :  { %s22_s0 = inlined_call_operand.vmem [shape: f32[4], index: 0, kind: input, shape index: {}]   ;;  %s23_s1 = inlined_call_operand.vmem [shape: f32[2,4], index: 1, kind: output, shape index: {}]  }
   0x1   :  { %v4_v0 = vld [vmem:[%s22_s0] ss:$0 sm:$0xff] }
   0x2   :  { %5 = vst [vmem:[%s23_s1] sm:$0x3] %v4_v0 }

// kernel: tile.18
= control target key start
LH: loop header
LB: loop body
LE: loop exit
PB: predicated region body
PF: predicated region fallthrough
CT: control target
= control target key end

     0   :  { %vm7_vm0 = vcmask 31744   ;;  %vm13_vm1 = vcmask 64544   ;;  %s39_s0 = inlined_call_operand.vmem [shape: f32[2,4], index: 0, kind: input, shape index: {}]   ;;  %s40_s1 = inlined_call_operand.vmem [shape: f32[8,1], index: 1, kind: output, shape index: {}]  }
   0x1   :  { %v4_v0 = vld [vmem:[%s39_s0] sm:$0x3]  ;;  %s22_s0 = smov 4  }
   0x2   :  { %5 = vst [vmem:[#allocation1] sm:$0x3] %v4_v0 }
   0x9   :  { %v10_v1 = vld [vmem:[#allocation1 + $0x1] sm:$0x1]   ;;  %v6_v2 = vld [vmem:[#allocation1] sm:$0x1]  }
   0xa   :  { %11 = vrot.lane.b32.xlu0 %v10_v1, %s22_s0  ;;  %8 = vst.msk [vmem:[#allocation0] sm:$0x1] %vm7_vm0, %v6_v2  }
  0x7c   :  { %v12_v3 = vpop.permute.xlu0 %11  }
  0x7d   :  { %14 = vst.msk [vmem:[#allocation0] sm:$0x1] %vm13_vm1, %v12_v3  }
  0x84   :  { %v17_v4 = vld [vmem:[#allocation0] sm:$0x1] }
  0x85   :  { %20 = vst [vmem:[%s40_s1] sm:$0x1] %v17_v4 }

// kernel: normalize_by_channel_mean_std.1
= control target key start
LH: loop header
LB: loop body
LE: loop exit
PB: predicated region body
PF: predicated region fallthrough
CT: control target
= control target key end

     0   :  { %s384_s9 = smov 0   ;;  %s386_s10 = smov 0   ;;  %s417_s0 = inlined_call_operand.vmem [shape: f32[8,2], index: 0, kind: input, shape index: {}]   ;;  %s418_s1 = inlined_call_operand.vmem [shape: f32[8,256], index: 1, kind: input, shape index: {}]   ;;  %s419_s2 = inlined_call_operand.vmem [shape: f32[8,256], index: 2, kind: output, shape index: {}]  }
   0x1   :  { %s388_s11 = smov 0  }
   0x2 LB: > { %s21_s12 = sadd.s32 1, %s361_s10  ;;  %p310_p0 = scmp.ge.s32.totalorder %s365_s11, 1  ;;  %s365_s11 = sphi %s388_s11, %s12_s11   ;;  %s361_s10 = sphi %s386_s10, %s421_s10   ;;  %s357_s9 = sphi %s384_s9, %s420_s9  }
   0x3   : > { %p22_p1 = scmp.ge.s32.totalorder %s21_s12, 2  ;;  %p140_p2 = scmp.lt.s32.totalorder %s365_s11, 3 }
   0x5   : > { %s423_s12 = smov (%p22_p1, %s21_s12), 0  ;;  %p141_p3 = pnand %p310_p0, %p140_p2 }
   0x6   : > { %p178_p4 = scmp.lt.s32.totalorder (!%p141_p3), %s357_s9, 1 }
   0x7   : > { %144 = sbr.rel (%p141_p3) target bundleno = 141 (0x8d), region = 28 }
   0xc   : > { %v192_v0 = vld [vmem:[%s417_s0] sm:$0xff]  ;;  %v367_v1 = vmov 0   ;;  %v368_v2 = vmov 1   ;;  %s425_s9 = smov (!%p178_p4, %s357_s9), 1 }
   0xd   : > { %341 = vset.pattern.permute.xlu0 %v367_v1  ;;  %s311_s15 = sshll.u32 %s425_s9, 3 }
   0xe   : > { %196 = vperm.xlu0 %341, %v192_v0   ;;  %s183_s18 = scalar_lea.vmem %s418_s1, %s311_s15  ;;  %s191_s21 = scalar_lea.vmem %s419_s2, %s311_s15 }
   0xf   : > { %v193_v4 = vld [vmem:[%s183_s18] sm:$0xff] }
  0x16   : > { %342 = vset.pattern.permute.xlu0 %v368_v2 }
  0x17   : > { %201 = vperm.xlu0 %342, %v192_v0  }
  0x80   : > { %v197_v3 = vpop.permute.xlu0 %196 }
  0x81   : > { %v199_v5 = vmul.f32 %v197_v3, %v193_v4 }
  0x89   : > { %v202_v6 = vpop.permute.xlu0 %201 }
  0x8a   : > { %v204_v7 = vadd.f32 %v202_v6, %v199_v5 }
  0x8c   : > { %205 = vst [vmem:[%s191_s21] sm:$0xff] %v204_v7 }
  0x8d PF: > { %s12_s11 = sadd.s32 1, %s365_s11   ;;  %s420_s9 = smov %s361_s10 }
  0x8e   : > { %p9_p5 = scmp.ge.s32.totalorder %s12_s11, 4   ;;  %s421_s10 = smov %s423_s12 }
  0x90   :  { %11 = sbr.rel (!%p9_p5) target bundleno = 2 (0x2), region = 61 }

</bundles_post_ra>
